<compile_context>
chip_gen: v5e
topology: v5e:2x2
jax: 0.10.0
libtpu: 0.0.40
codegen_flags: <defaults>
</compile_context>

<pallas_src>
import functools
import math

import numpy as np
import jax
import jax.numpy as jnp
from jax.experimental import pallas as pl
from jax.experimental.pallas import tpu as pltpu


def _vmem_limit_bytes():
    """Per-generation scoped VMEM limit (v5e/v6e: ~100 MiB, v7x: ~56 MiB)."""
    try:
        cap = int(pltpu.get_tpu_info().vmem_capacity_bytes)
    except Exception:
        cap = 64 * 1024 * 1024          # conservative fallback (v7x capacity)
    return max(32 * 1024 * 1024, min(cap - (8 << 20), 100 * 1024 * 1024))


def _vmem_bytes(tq, s_k, d_k, d_v, kv_buffers, attn_itemsize, out_itemsize):
    """Rough resident-VMEM audit for one grid step."""
    bf16 = 2
    kv = kv_buffers * s_k * (d_k + d_v) * bf16      # resident K + V blocks
    q_io = 2 * tq * d_k * bf16                      # double-buffered q tile
    ctx_io = 2 * tq * d_v * out_itemsize            # double-buffered ctx out
    attn_io = 2 * tq * s_k * attn_itemsize          # double-buffered attn out
    f32_tmp = 3 * tq * s_k * 4                      # scores / exp / attn (f32)
    return kv + q_io + ctx_io + attn_io + f32_tmp


def _pick_tq(s_q, max_tq, sublane):
    """Largest q tile <= max_tq needing no padding; (tq, padded_s_q)."""
    if s_q <= max_tq:
        return s_q, s_q                              # single full-extent tile
    t = (max_tq // sublane) * sublane
    while t >= sublane:
        if s_q % t == 0:
            return t, s_q                            # exact divisor, no pad
        t -= sublane
    t = (max_tq // sublane) * sublane                # documented slow path:
    return t, ((s_q + t - 1) // t) * t               # pad q rows only


def _sdpa_kernel(scale, q_ref, k_ref, v_ref, ctx_ref, attn_ref):
    f32 = jnp.float32
    # Fold 1/sqrt(d_k) into the small [tq, d_k] query tile (f32 mul), then
    # back to bf16 for the MXU.
    q = (q_ref[0].astype(f32) * scale).astype(q_ref.dtype)

    # scores = (q / sqrt(d_k)) @ k^T : bf16 MXU inputs, f32 accumulation.
    scores = jax.lax.dot_general(
        q, k_ref[0], (((1,), (1,)), ((), ())), preferred_element_type=f32)

    # Row softmax in f32. Exact reciprocal: kernel is HBM-writeback-bound, so
    # the extra EUP cost is hidden and attn rows sum to 1 (PyTorch parity).
    m = jnp.max(scores, axis=-1, keepdims=True)
    e = jnp.exp(scores - m)
    attn = e * pl.reciprocal(jnp.sum(e, axis=-1, keepdims=True))

    # bf16 probabilities computed once: reused for the store (if attn output is
    # bf16) and for the PV matmul.
    attn_bf16 = attn.astype(jnp.bfloat16)
    attn_ref[0] = (attn_bf16 if attn_ref.dtype == jnp.bfloat16
                   else attn.astype(attn_ref.dtype))

    ctx = jnp.dot(attn_bf16, v_ref[0], preferred_element_type=f32)
    ctx_ref[0] = ctx.astype(ctx_ref.dtype)


def scaled_dot_product_attention(q, k, v, *, block_q=256, attn_dtype=None,
                                 single_buffer_kv=False, interpret=False):
    """q: [..., S_q, d_k], k: [..., S_k, d_k], v: [..., S_k, d_v].

    Returns (context [..., S_q, d_v], attn [..., S_q, S_k]) — the PyTorch
    module's forward with attn_mask=None, dropout=None.
    attn_dtype=jnp.bfloat16 halves the dominant attn HBM writeback if the
    caller tolerates a bf16 probability matrix.
    """
    out_dtype = q.dtype
    attn_dtype = out_dtype if attn_dtype is None else np.dtype(attn_dtype)
    *lead, s_q, d_k = q.shape
    s_k, d_v = k.shape[-2], v.shape[-1]
    assert k.shape[-1] == d_k and v.shape[-2] == s_k

    bh = math.prod(lead) if lead else 1
    compute_dtype = jnp.bfloat16
    # One-time boundary cast: bf16 MXU operands, half K/V HBM + VMEM traffic.
    q3 = q.reshape(bh, s_q, d_k).astype(compute_dtype)
    k3 = k.reshape(bh, s_k, d_k).astype(compute_dtype)
    v3 = v.reshape(bh, s_k, d_v).astype(compute_dtype)

    # ---- per-generation VMEM budget & tile plan -----------------------------
    vmem_limit = _vmem_limit_bytes()
    sublane = 16                         # bf16 sublane packing
    kv_buffers = 1 if single_buffer_kv else 2
    attn_isz = np.dtype(attn_dtype).itemsize
    out_isz = np.dtype(out_dtype).itemsize

    max_tq = max(sublane, (block_q // sublane) * sublane)
    while (max_tq > sublane and
           _vmem_bytes(max_tq, s_k, d_k, d_v, kv_buffers,
                       attn_isz, out_isz) > int(0.8 * vmem_limit)):
        max_tq = max(sublane, (max_tq // 2 // sublane) * sublane)

    tq, s_q_pad = _pick_tq(s_q, max_tq, sublane)
    if s_q_pad != s_q:
        # Slow path: pad only the (small) q rows; outputs sliced afterwards.
        q3 = jnp.pad(q3, ((0, 0), (0, s_q_pad - s_q), (0, 0)))

    grid = (bh, s_q_pad // tq)
    kv_kwargs = {"pipeline_mode": pl.Buffered(1)} if single_buffer_kv else {}
    kernel = functools.partial(_sdpa_kernel, 1.0 / math.sqrt(d_k))

    ctx3, attn3 = pl.pallas_call(
        kernel,
        out_shape=(
            jax.ShapeDtypeStruct((bh, s_q_pad, d_v), out_dtype),
            jax.ShapeDtypeStruct((bh, s_q_pad, s_k), attn_dtype),
        ),
        grid=grid,
        in_specs=[
            pl.BlockSpec((1, tq, d_k), lambda b, i: (b, i, 0)),          # q
            pl.BlockSpec((1, s_k, d_k), lambda b, i: (b, 0, 0),          # K
                         **kv_kwargs),
            pl.BlockSpec((1, s_k, d_v), lambda b, i: (b, 0, 0),          # V
                         **kv_kwargs),
        ],
        out_specs=(
            pl.BlockSpec((1, tq, d_v), lambda b, i: (b, i, 0)),          # ctx
            pl.BlockSpec((1, tq, s_k), lambda b, i: (b, i, 0)),          # attn
        ),
        compiler_params=pltpu.CompilerParams(
            dimension_semantics=("parallel", "arbitrary"),
            vmem_limit_bytes=vmem_limit,
        ),
        interpret=interpret,
    )(q3, k3, v3)

    if s_q_pad != s_q:
        ctx3 = ctx3[:, :s_q, :]
        attn3 = attn3[:, :s_q, :]
    ctx = ctx3.reshape(*lead, s_q, d_v)
    attn = attn3.reshape(*lead, s_q, s_k)
    return ctx, attn


if __name__ == "__main__":
    # Small shapes consistent with multi-head attention: [batch, heads, seq, d].
    B, H, S, D_K, D_V = 2, 2, 128, 32, 32

    key = jax.random.PRNGKey(0)
    kq, kk, kv = jax.random.split(key, 3)
    q = jax.random.normal(kq, (B, H, S, D_K), jnp.float32)
    k = jax.random.normal(kk, (B, H, S, D_K), jnp.float32)
    v = jax.random.normal(kv, (B, H, S, D_V), jnp.float32)

    ctx, attn = scaled_dot_product_attention(q, k, v)
    ctx, attn = jax.block_until_ready((ctx, attn))

    assert ctx.shape == (B, H, S, D_V) and ctx.dtype == q.dtype
    assert attn.shape == (B, H, S, S) and attn.dtype == q.dtype

    # Pure-JAX f32 reference; loose tolerance because the kernel uses bf16 MXU
    # inputs (q, k, v and the probability matrix) with f32 accumulation.
    scores_ref = jnp.einsum("bhqd,bhkd->bhqk", q, k) / math.sqrt(D_K)
    attn_ref = jax.nn.softmax(scores_ref, axis=-1)
    ctx_ref = jnp.einsum("bhqk,bhkd->bhqd", attn_ref, v)
    assert jnp.allclose(attn, attn_ref, atol=5e-2, rtol=5e-2), \
        float(jnp.max(jnp.abs(attn - attn_ref)))
    assert jnp.allclose(ctx, ctx_ref, atol=5e-2, rtol=5e-2), \
        float(jnp.max(jnp.abs(ctx - ctx_ref)))

    print("KERNEL_OK")
</pallas_src>

<mosaic_0001>
module attributes {stable_mosaic.version = 11 : i64} {
  func.func @_sdpa_kernel(%arg0: i32, %arg1: i32, %arg2: memref<1x128x32xbf16, #tpu.memory_space<vmem>>, %arg3: memref<1x128x32xbf16, #tpu.memory_space<vmem>>, %arg4: memref<1x128x32xbf16, #tpu.memory_space<vmem>>, %arg5: memref<1x128x32xf32, #tpu.memory_space<vmem>>, %arg6: memref<1x128x128xf32, #tpu.memory_space<vmem>>) attributes {dimension_semantics = [#tpu.dimension_semantics<parallel>, #tpu.dimension_semantics<arbitrary>], iteration_bounds = array<i64: 4, 1>, scalar_prefetch = 0 : i64, scratch_operands = 0 : i64, tpu.core_type = #tpu.core_type<tc>, window_params = [{transform_indices = @transform_0, window_bounds = array<i64: 1, 128, 32>}, {transform_indices = @transform_1, window_bounds = array<i64: 1, 128, 32>}, {transform_indices = @transform_2, window_bounds = array<i64: 1, 128, 32>}, {transform_indices = @transform_3, window_bounds = array<i64: 1, 128, 32>}, {transform_indices = @transform_4, window_bounds = array<i64: 1, 128, 128>}]} {
    %c0 = arith.constant 0 : index
    %c0_0 = arith.constant 0 : index
    %c0_1 = arith.constant 0 : index
    %0 = vector.load %arg2[%c0, %c0_0, %c0_1] : memref<1x128x32xbf16, #tpu.memory_space<vmem>>, vector<1x128x32xbf16>
    %1 = vector.shape_cast %0 : vector<1x128x32xbf16> to vector<128x32xbf16>
    %2 = arith.extf %1 : vector<128x32xbf16> to vector<128x32xf32>
    %cst = arith.constant 0.176776692 : f32
    %3 = vector.broadcast %cst : f32 to vector<128x32xf32>
    %4 = arith.mulf %2, %3 : vector<128x32xf32>
    %5 = arith.truncf %4 : vector<128x32xf32> to vector<128x32xbf16>
    %c0_2 = arith.constant 0 : index
    %c0_3 = arith.constant 0 : index
    %c0_4 = arith.constant 0 : index
    %6 = vector.load %arg3[%c0_2, %c0_3, %c0_4] : memref<1x128x32xbf16, #tpu.memory_space<vmem>>, vector<1x128x32xbf16>
    %7 = vector.shape_cast %6 : vector<1x128x32xbf16> to vector<128x32xbf16>
    %cst_5 = arith.constant dense<0.000000e+00> : vector<128x128xf32>
    %8 = tpu.matmul %5, %7, %cst_5 {dimension_numbers = #tpu.dot_dimension_numbers<[1], [1], [0], [0], [0, 0, 1, 0], [], []>} : vector<128x32xbf16>, vector<128x32xbf16>, vector<128x128xf32> -> vector<128x128xf32>
    %cst_6 = arith.constant dense<0xFF800000> : vector<128xf32>
    %9 = vector.multi_reduction <maximumf>, %8, %cst_6 [1] : vector<128x128xf32> to vector<128xf32>
    %10 = vector.shape_cast %9 : vector<128xf32> to vector<128x1xf32>
    %11 = vector.broadcast %10 : vector<128x1xf32> to vector<128x128xf32>
    %12 = arith.subf %8, %11 : vector<128x128xf32>
    %13 = math.exp %12 : vector<128x128xf32>
    %cst_7 = arith.constant dense<0.000000e+00> : vector<128xf32>
    %14 = vector.multi_reduction <add>, %13, %cst_7 [1] : vector<128x128xf32> to vector<128xf32>
    %15 = vector.shape_cast %14 : vector<128xf32> to vector<128x1xf32>
    %16 = tpu.reciprocal %15 : vector<128x1xf32> -> vector<128x1xf32>
    %17 = vector.broadcast %16 : vector<128x1xf32> to vector<128x128xf32>
    %18 = arith.mulf %13, %17 : vector<128x128xf32>
    %19 = arith.truncf %18 : vector<128x128xf32> to vector<128x128xbf16>
    %c0_8 = arith.constant 0 : index
    %c0_9 = arith.constant 0 : index
    %c0_10 = arith.constant 0 : index
    %20 = vector.load %arg6[%c0_8, %c0_9, %c0_10] : memref<1x128x128xf32, #tpu.memory_space<vmem>>, vector<1x128x128xf32>
    %21 = vector.shape_cast %20 : vector<1x128x128xf32> to vector<128x128xf32>
    %22 = vector.shape_cast %18 : vector<128x128xf32> to vector<1x128x128xf32>
    tpu.vector_store %arg6[%c0_8, %c0_9, %c0_10], %22 {strides = array<i32>} : memref<1x128x128xf32, #tpu.memory_space<vmem>>, vector<1x128x128xf32>,
    %c0_11 = arith.constant 0 : index
    %c0_12 = arith.constant 0 : index
    %c0_13 = arith.constant 0 : index
    %23 = vector.load %arg4[%c0_11, %c0_12, %c0_13] : memref<1x128x32xbf16, #tpu.memory_space<vmem>>, vector<1x128x32xbf16>
    %24 = vector.shape_cast %23 : vector<1x128x32xbf16> to vector<128x32xbf16>
    %cst_14 = arith.constant dense<0.000000e+00> : vector<128x32xf32>
    %25 = tpu.matmul %19, %24, %cst_14 {dimension_numbers = #tpu.dot_dimension_numbers<[1], [0], [0], [1], [0, 0, 1, 1], [], []>} : vector<128x128xbf16>, vector<128x32xbf16>, vector<128x32xf32> -> vector<128x32xf32>
    %c0_15 = arith.constant 0 : index
    %c0_16 = arith.constant 0 : index
    %c0_17 = arith.constant 0 : index
    %26 = vector.load %arg5[%c0_15, %c0_16, %c0_17] : memref<1x128x32xf32, #tpu.memory_space<vmem>>, vector<1x128x32xf32>
    %27 = vector.shape_cast %26 : vector<1x128x32xf32> to vector<128x32xf32>
    %28 = vector.shape_cast %25 : vector<128x32xf32> to vector<1x128x32xf32>
    tpu.vector_store %arg5[%c0_15, %c0_16, %c0_17], %28 {strides = array<i32>} : memref<1x128x32xf32, #tpu.memory_space<vmem>>, vector<1x128x32xf32>,
    return
  }
  func.func @transform_0(%arg0: i32, %arg1: i32) -> (i32, i32, i32) {
    %c0_i32 = arith.constant 0 : i32
    %c0_i32_0 = arith.constant 0 : i32
    return %arg0, %arg1, %c0_i32 : i32, i32, i32
  }
  func.func @transform_1(%arg0: i32, %arg1: i32) -> (i32, i32, i32) {
    %c0_i32 = arith.constant 0 : i32
    %c0_i32_0 = arith.constant 0 : i32
    %c0_i32_1 = arith.constant 0 : i32
    return %arg0, %c0_i32, %c0_i32_0 : i32, i32, i32
  }
  func.func @transform_2(%arg0: i32, %arg1: i32) -> (i32, i32, i32) {
    %c0_i32 = arith.constant 0 : i32
    %c0_i32_0 = arith.constant 0 : i32
    %c0_i32_1 = arith.constant 0 : i32
    return %arg0, %c0_i32, %c0_i32_0 : i32, i32, i32
  }
  func.func @transform_3(%arg0: i32, %arg1: i32) -> (i32, i32, i32) {
    %c0_i32 = arith.constant 0 : i32
    %c0_i32_0 = arith.constant 0 : i32
    return %arg0, %arg1, %c0_i32 : i32, i32, i32
  }
  func.func @transform_4(%arg0: i32, %arg1: i32) -> (i32, i32, i32) {
    %c0_i32 = arith.constant 0 : i32
    %c0_i32_0 = arith.constant 0 : i32
    return %arg0, %arg1, %c0_i32 : i32, i32, i32
  }
}

</mosaic_0001>

<bundles_post_ra>
// kernel: tpu_custom_call.1
= control target key start
LH: loop header
LB: loop body
LE: loop exit
PB: predicated region body
PF: predicated region fallthrough
CT: control target
= control target key end

     0   :  { %10 = vsyncpa [#allocation3], 0  ;;  %s1941_s0 = inlined_call_operand.vmem [shape: bf16[4,128,32], index: 0, kind: input, shape index: {}]   ;;  %s1942_s1 = inlined_call_operand.vmem [shape: bf16[4,128,32], index: 1, kind: input, shape index: {}]   ;;  %s1943_s2 = inlined_call_operand.vmem [shape: bf16[4,128,32], index: 2, kind: input, shape index: {}]   ;;  %s1944_s3 = inlined_call_operand.vmem [shape: f32[4,128,32], index: 3, kind: output, shape index: {0}]   ;;  %s1945_s4 = inlined_call_operand.hbm [shape: f32[4,128,128], index: 4, kind: output, shape index: {1}]  }
   0x1   :  { %12 = vsyncpa [#allocation3 + $0x1], 0  ;;  %s1572_s15 = smov 0   ;;  %s1574_s16 = smov 0  }
   0x2   :  { %s1576_s17 = smov 0   ;;  %s1578_s18 = smov 0  }
   0x3   :  { %s1580_s19 = smov 0   ;;  %s1582_s20 = smov 0  }
   0x4 LB: > { %s1177_s21 = sadd.s32 4294967295, %s1543_s20   ;;  %s1178_s22 = sadd.s32 4294967294, %s1543_s20   ;;  %s1543_s20 = sphi %s1582_s20, %s18_s20   ;;  %s1539_s19 = sphi %s1580_s19, %s1954_s19   ;;  %s1535_s18 = sphi %s1578_s18, %s1953_s18   ;;  %s1531_s17 = sphi %s1576_s17, %s1952_s17   ;;  %s1527_s16 = sphi %s1574_s16, %s1951_s16   ;;  %s1523_s15 = sphi %s1572_s15, %s1950_s15  }
   0x5   : > { %s30_s23 = sadd.s32 1, %s1539_s19  ;;  %s147_s24 = sadd.s32 1, %s1531_s17 }
   0x6   : > { %p32_p0 = scmp.ge.s32.totalorder %s30_s23, 4  ;;  %p157_p1 = scmp.ne.s32.totalorder %s1531_s17, %s1527_s16 }
   0x7   : > { %p158_p2 = scmp.eq.s32.totalorder %s1177_s21, 3  ;;  %p163_p3 = scmp.ne.s32.totalorder %s1527_s16, %s1523_s15 }
   0x8   : > { %s1956_s23 = smov (%p32_p0, %s30_s23), 0  ;;  %p164_p5 = scmp.eq.s32.totalorder %s1178_s22, 3 }
   0x9   : > { %p1612_p4 = por %p158_p2, %p157_p1  ;;  %s142_s26 = ssub.s32 %s1539_s19, %s1956_s23 }
   0xa   : > { %p1181_p6 = scmp.ge.s32.totalorder %s1543_s20, 1  ;;  %p145_p7 = scmp.eq.s32.totalorder %s142_s26, 0 }
   0xb   : > { %p1619_p8 = por %p164_p5, %p163_p3  ;;  %p211_p9 = scmp.lt.s32.totalorder %s1543_s20, 5 }
   0xc   : > { %s1625_s28 = scalar_select %p145_p7, %s1531_s17, %s147_s24  }
   0xd   : > { %p212_p10 = pnand %p1181_p6, %p211_p9 }
   0xe   : > { %p261_p11 = scmp.lt.s32.totalorder (!%p212_p10), %s1535_s18, 3  ;;  %s257_s14 = sand.u32 (!%p212_p10), 1, %s1527_s16  }
   0xf   : > { %215 = sbr.rel (%p212_p10) target bundleno = 757 (0x2f5), region = 32  ;;  %s1182_s21 = sshll.u32 (!%p212_p10), %s257_s14, 7 }
  0x10   : > { %s1773_s22 = scalar_lea.vmem (!%p212_p10), [#allocation2], %s1182_s21  ;;  %s1016_s11 = scalar_lea.sflag (!%p212_p10), [#allocation3], %s257_s14 }
  0x11   : > { %s1034_s6 = sshll.u32 (!%p212_p10), %s1773_s22, 4  ;;  %s1035_s6 = int_to_ptr.vmem [resolvable:$true] %s1034_s6 }
  0x14   : > { %s1629_s29 = scalar_select %p261_p11, %s1535_s18, 3  ;;  %vm403_vm0 = vcmask 261120  }
  0x16   : > { %s1632_s30 = sshll.u32 %s1629_s29, 6  ;;  %s1271_s24 = sshll.u32 %s1629_s29, 7 }
  0x17   : > { %s1638_s7 = scalar_lea.vmem %s1942_s1, %s1632_s30  ;;  %s1657_s10 = scalar_lea.vmem %s1941_s0, %s1632_s30 }
  0x18   : > { %v1279_v0 = vld [vmem:[%s1638_s7 + $0x38] sm:$0xff]  ;;  %v1278_v2 = vld [vmem:[%s1638_s7 + $0x30] sm:$0xff]  ;;  %v1277_v4 = vld [vmem:[%s1638_s7 + $0x28] sm:$0xff]  ;;  %s1728_s13 = scalar_lea.vmem %s1943_s2, %s1632_s30  ;;  %s1864_s5 = scalar_lea.vmem %s1944_s3, %s1271_s24 }
  0x19   : > { %v450_v1 = vsel %vm403_vm0, %v1279_v0, 0  ;;  %v447_v3 = vsel %vm403_vm0, %v1278_v2, 0  ;;  %v444_v5 = vsel %vm403_vm0, %v1277_v4, 0  ;;  %v1276_v6 = vld [vmem:[%s1638_s7 + $0x20] sm:$0xff]  ;;  %v1275_v8 = vld [vmem:[%s1638_s7 + $0x18] sm:$0xff]  ;;  %v1274_v10 = vld [vmem:[%s1638_s7 + $0x10] sm:$0xff] }
  0x1a   : > { %452 = vmatpush.bf16.xpose.msra.mxu0 %v450_v1  ;;  %1328 = vmatpush.bf16.xpose.msra.mxu2 %v450_v1  ;;  %v441_v7 = vsel %vm403_vm0, %v1276_v6, 0  ;;  %v438_v9 = vsel %vm403_vm0, %v1275_v8, 0  ;;  %v435_v11 = vsel %vm403_vm0, %v1274_v10, 0  ;;  %v1273_v12 = vld [vmem:[%s1638_s7 + $0x8] sm:$0xff]  ;;  %v1290_v14 = vld [vmem:[%s1657_s10] sm:$0xff]   ;;  %v1323_v15 = vld [vmem:[%s1657_s10 + $0x18] sm:$0xff]  }
  0x1b   : > { %v432_v13 = vsel %vm403_vm0, %v1273_v12, 0  ;;  %v1272_v16 = vld [vmem:[%s1638_s7] sm:$0xff]  ;;  %v1291_v17 = vunpack.c.l.bf16 %v1290_v14  ;;  %v1292_v18 = vunpack.c.h.bf16 %v1290_v14  ;;  %v1303_v19 = vunpack.c.l.bf16 %v1323_v15  ;;  %v1321_v28 = vld [vmem:[%s1657_s10 + $0x8] sm:$0xff]   ;;  %v1322_v40 = vld [vmem:[%s1657_s10 + $0x10] sm:$0xff]   ;;  %s1288_s29 = sshll.u32 %s1535_s18, 7 }
  0x1c   : > { %v1304_v20 = vunpack.c.h.bf16 %v1323_v15  ;;  %v429_v21 = vsel %vm403_vm0, %v1272_v16, 0  ;;  %v1324_v29 = vld [vmem:[%s1657_s10 + $0x20] sm:$0xff]   ;;  %v1295_v30 = vunpack.c.l.bf16 %v1321_v28  ;;  %v1296_v31 = vunpack.c.h.bf16 %v1321_v28  ;;  %v1325_v41 = vld [vmem:[%s1657_s10 + $0x28] sm:$0xff]   ;;  %v1326_v52 = vld [vmem:[%s1657_s10 + $0x30] sm:$0xff]   ;;  %s1033_s9 = scalar_lea.hbm %s1945_s4, %s1288_s29 }
  0x1d   : > { %v323_v22 = vmul.f32 0.17677669, %v1291_v17  ;;  %v324_v23 = vmul.f32 0.17677669, %v1292_v18  ;;  %v329_v24 = vmul.f32 0.17677669, %v1303_v19  ;;  %v1307_v32 = vunpack.c.l.bf16 %v1324_v29 }
  0x1e   : > { %v330_v25 = vmul.f32 0.17677669, %v1304_v20  ;;  %v1308_v33 = vunpack.c.h.bf16 %v1324_v29  ;;  %v325_v34 = vmul.f32 0.17677669, %v1295_v30  ;;  %v326_v35 = vmul.f32 0.17677669, %v1296_v31 }
  0x1f   : > { %v339_v26 = vpack.c.bf16 %v324_v23, %v323_v22  ;;  %v331_v36 = vmul.f32 0.17677669, %v1307_v32  ;;  %v1299_v42 = vunpack.c.l.bf16 %v1322_v40  ;;  %v1300_v43 = vunpack.c.h.bf16 %v1322_v40  ;;  %v1327_v58 = vld [vmem:[%s1657_s10 + $0x38] sm:$0xff]   ;;  %s1036_s10 = sshll.u32 %s1033_s9, 4  ;;  %s1037_s10 = int_to_ptr.hbm [resolvable:$true] %s1036_s10 }
  0x20   : > { %v342_v27 = vpack.c.bf16 %v330_v25, %v329_v24  ;;  %v332_v37 = vmul.f32 0.17677669, %v1308_v33  ;;  %v340_v38 = vpack.c.bf16 %v326_v35, %v325_v34  ;;  %v1311_v44 = vunpack.c.l.bf16 %v1325_v41  ;;  %s1479_s12 = sshra.s32 %s1037_s10, 4  ;;  %s1480_s12 = int_to_ptr.hbm [resolvable:$true] %s1479_s12 }
  0x21   : > { %v1312_v45 = vunpack.c.h.bf16 %v1325_v41  ;;  %v327_v46 = vmul.f32 0.17677669, %v1299_v42  ;;  %v328_v47 = vmul.f32 0.17677669, %v1300_v43  ;;  %v1315_v53 = vunpack.c.l.bf16 %v1326_v52  ;;  %p1486_p1 = scmp.lt.s32.totalorder %s1480_s12, %s1945_s4 }
  0x22   : > { %453 = vmatpush.bf16.xpose.msra.mxu0 %v447_v3  ;;  %1329 = vmatpush.bf16.xpose.msra.mxu2 %v447_v3  ;;  %v343_v39 = vpack.c.bf16 %v332_v37, %v331_v36  ;;  %v333_v48 = vmul.f32 0.17677669, %v1311_v44  ;;  %v1316_v54 = vunpack.c.h.bf16 %v1326_v52  ;;  %v1319_v59 = vunpack.c.l.bf16 %v1327_v58 }
  0x23   : > { %v334_v49 = vmul.f32 0.17677669, %v1312_v45  ;;  %v341_v50 = vpack.c.bf16 %v328_v47, %v327_v46  ;;  %v335_v55 = vmul.f32 0.17677669, %v1315_v53  ;;  %v1320_v60 = vunpack.c.h.bf16 %v1327_v58 }
  0x24   : > { %v336_v56 = vmul.f32 0.17677669, %v1316_v54  ;;  %v337_v61 = vmul.f32 0.17677669, %v1319_v59  ;;  %v1287_v54 = vld [vmem:[%s1728_s13 + $0x38] sm:$0xff] }
  0x25   : > { %v344_v51 = vpack.c.bf16 %v334_v49, %v333_v48  ;;  %v338_v62 = vmul.f32 0.17677669, %v1320_v60  ;;  %941 = vmatpush.bf16.msra.mxu1 %v1287_v54  ;;  %1336 = vmatpush.bf16.msra.mxu3 %v1287_v54 }
  0x26   : > { %v345_v57 = vpack.c.bf16 %v336_v56, %v335_v55 }
  0x27   : > { %v346_v63 = vpack.c.bf16 %v338_v62, %v337_v61 }
  0x2a   : > { %454 = vmatpush.bf16.xpose.msra.mxu0 %v444_v5  ;;  %1330 = vmatpush.bf16.xpose.msra.mxu2 %v444_v5 }
  0x32   : > { %455 = vmatpush.bf16.xpose.msra.mxu0 %v441_v7  ;;  %1331 = vmatpush.bf16.xpose.msra.mxu2 %v441_v7 }
  0x3a   : > { %456 = vmatpush.bf16.xpose.msra.mxu0 %v438_v9  ;;  %1332 = vmatpush.bf16.xpose.msra.mxu2 %v438_v9 }
  0x42   : > { %457 = vmatpush.bf16.xpose.msra.mxu0 %v435_v11  ;;  %1333 = vmatpush.bf16.xpose.msra.mxu2 %v435_v11 }
  0x4a   : > { %458 = vmatpush.bf16.xpose.msra.mxu0 %v432_v13  ;;  %1334 = vmatpush.bf16.xpose.msra.mxu2 %v432_v13 }
  0x52   : > { %459 = vmatpush.bf16.xpose.msra.mxu0 %v429_v21  ;;  %1335 = vmatpush.bf16.xpose.msra.mxu2 %v429_v21 }
  0x59   : > { %1223 = vmatmul.msk.bf16.vlgmr.msra.gmra.mxu0 %vm403_vm0, %v339_v26  ;;  %1226 = vmatmul.msk.bf16.vlgmr.msra.gmra.mxu2 %vm403_vm0, %v342_v27 }
  0x69   : > { %1224 = vmatmul.msk.bf16.gmra.mxu0 %vm403_vm0, %v340_v38  ;;  %1227 = vmatmul.msk.bf16.gmra.mxu2 %vm403_vm0, %v343_v39 }
  0x79   : > { %1225 = vmatmul.msk.bf16.gmra.mxu0 %vm403_vm0, %v341_v50  ;;  %1228 = vmatmul.msk.bf16.gmra.mxu2 %vm403_vm0, %v344_v51 }
  0x89   : > { %1229 = vmatmul.msk.bf16.gmra.mxu2 %vm403_vm0, %v345_v57 }
  0x99   : > { %1230 = vmatmul.msk.bf16.gmra.mxu2 %vm403_vm0, %v346_v63 }
  0xd6   : > { %v461_v0 = vpop.f32.mrf.mxu0 }
  0xd7   : > { %501 = vmax.xlane.f32.xlu0 %v461_v0 }
  0xdc   : > { %v1678_v1 = vpop.f32.mrf.mxu2 }
  0xde   : > { %v463_v2 = vpop.f32.mrf.mxu0 }
  0xdf   : > { %503 = vmax.xlane.f32.xlu0 %v463_v2 }
  0xe4   : > { %v1680_v3 = vpop.f32.mrf.mxu2 }
  0xe6   : > { %v466_v4 = vpop.f32.mrf.mxu0 }
  0xe7   : > { %505 = vmax.xlane.f32.xlu1 %v466_v4 }
  0xec   : > { %v1682_v5 = vpop.f32.mrf.mxu2 }
  0xee   : > { %v468_v6 = vpop.f32.mrf.mxu0 }
  0xef   : > { %507 = vmax.xlane.f32.xlu1 %v468_v6 }
  0xf4   : > { %v1684_v7 = vpop.f32.mrf.mxu2 }
  0xf6   : > { %v471_v8 = vpop.f32.mrf.mxu0 }
  0xf7   : > { %509 = vmax.xlane.f32.xlu0 %v471_v8 }
  0xfc   : > { %v486_v9 = vpop.f32.mrf.mxu2 }
  0xfd   : > { %521 = vmax.xlane.f32.xlu2 %v486_v9 }
  0xfe   : > { %v473_v10 = vpop.f32.mrf.mxu0 }
  0xff   : > { %511 = vmax.xlane.f32.xlu1 %v473_v10 }
 0x104   : > { %v488_v11 = vpop.f32.mrf.mxu2 }
 0x105   : > { %523 = vmax.xlane.f32.xlu2 %v488_v11 }
 0x107   : > { %513 = vmax.xlane.f32.xlu1 %v1678_v1 }
 0x10c   : > { %v1687_v12 = vpop.f32.mrf.mxu2 }
 0x10d   : > { %525 = vmax.xlane.f32.xlu2 %v1687_v12 }
 0x114   : > { %v1690_v13 = vpop.f32.mrf.mxu2 }
 0x115   : > { %515 = vmax.xlane.f32.xlu2 %v1680_v3  ;;  %527 = vmax.xlane.f32.xlu0 %v1690_v13 }
 0x11c   : > { %v1694_v14 = vpop.f32.mrf.mxu2 }
 0x11d   : > { %529 = vmax.xlane.f32.xlu2 %v1694_v14 }
 0x124   : > { %v1703_v25 = vpop.f32.mrf.mxu2 }
 0x125   : > { %519 = vmax.xlane.f32.xlu2 %v1684_v7 }
 0x14a   : > { %v502_v15 = vpop.xlane.xlu0 %501 }
 0x14b   : > { %v533_v16 = vsub.f32 %v461_v0, %v502_v15  ;;  %v1281_v15 = vld [vmem:[%s1728_s13 + $0x8] sm:$0xff] }
 0x14d   : > { %v549_v17 = vmul.f32 1.442695, %v533_v16  ;;  %v1280_v16 = vld [vmem:[%s1728_s13] sm:$0xff] }
 0x14f   : > { %1401 = vpow2.f32 %v549_v17 }
 0x152   : > { %v504_v18 = vpop.xlane.xlu0 %503 }
 0x153   : > { %v534_v19 = vsub.f32 %v463_v2, %v504_v18 }
 0x155   : > { %v1698_v20 = vpop.eup %1401  ;;  %v551_v21 = vmul.f32 1.442695, %v534_v19 }
 0x156   : > { %581 = vadd.xlane.f32.xlu0 %v1698_v20 }
 0x157   : > { %1403 = vpow2.f32 %v551_v21 }
 0x15a   : > { %v506_v22 = vpop.xlane.xlu1 %505 }
 0x15b   : > { %v535_v23 = vsub.f32 %v466_v4, %v506_v22 }
 0x15d   : > { %v1701_v24 = vpop.eup %1403  ;;  %v553_v26 = vmul.f32 1.442695, %v535_v23 }
 0x15e   : > { %531 = vmax.xlane.f32.xlu0 %v1703_v25  ;;  %583 = vadd.xlane.f32.xlu1 %v1701_v24 }
 0x15f   : > { %1405 = vpow2.f32 %v553_v26 }
 0x162   : > { %v508_v27 = vpop.xlane.xlu1 %507 }
 0x163   : > { %v536_v28 = vsub.f32 %v468_v6, %v508_v27 }
 0x165   : > { %v1707_v29 = vpop.eup %1405  ;;  %v555_v30 = vmul.f32 1.442695, %v536_v28 }
 0x166   : > { %585 = vadd.xlane.f32.xlu0 %v1707_v29  ;;  %517 = vmax.xlane.f32.xlu1 %v1682_v5 }
 0x167   : > { %1407 = vpow2.f32 %v555_v30 }
 0x16a   : > { %v510_v31 = vpop.xlane.xlu0 %509 }
 0x16b   : > { %v537_v32 = vsub.f32 %v471_v8, %v510_v31 }
 0x16d   : > { %v1711_v33 = vpop.eup %1407  ;;  %v557_v34 = vmul.f32 1.442695, %v537_v32 }
 0x16e   : > { %587 = vadd.xlane.f32.xlu1 %v1711_v33 }
 0x16f   : > { %1409 = vpow2.f32 %v557_v34 }
 0x170   : > { %v522_v35 = vpop.xlane.xlu2 %521 }
 0x171   : > { %v543_v36 = vsub.f32 %v486_v9, %v522_v35 }
 0x172   : > { %v512_v37 = vpop.xlane.xlu1 %511 }
 0x173   : > { %v569_v38 = vmul.f32 1.442695, %v543_v36  ;;  %v538_v39 = vsub.f32 %v473_v10, %v512_v37 }
 0x175   : > { %v1714_v40 = vpop.eup %1409  ;;  %1411 = vpow2.f32 %v569_v38  ;;  %v559_v41 = vmul.f32 1.442695, %v538_v39 }
 0x176   : > { %589 = vadd.xlane.f32.xlu1 %v1714_v40 }
 0x177   : > { %1413 = vpow2.f32 %v559_v41 }
 0x178   : > { %v524_v42 = vpop.xlane.xlu2 %523 }
 0x179   : > { %v544_v43 = vsub.f32 %v488_v11, %v524_v42  ;;  %v1286_v11 = vld [vmem:[%s1728_s13 + $0x30] sm:$0xff] }
 0x17a   : > { %v514_v44 = vpop.xlane.xlu1 %513  ;;  %942 = vmatpush.bf16.msra.mxu1 %v1286_v11  ;;  %1337 = vmatpush.bf16.msra.mxu3 %v1286_v11 }
 0x17b   : > { %v1717_v45 = vpop.eup %1411  ;;  %v571_v46 = vmul.f32 1.442695, %v544_v43  ;;  %v539_v47 = vsub.f32 %v1678_v1, %v514_v44 }
 0x17c   : > { %601 = vadd.xlane.f32.xlu2 %v1717_v45 }
 0x17d   : > { %1415 = vpow2.f32 %v571_v46  ;;  %v561_v48 = vmul.f32 1.442695, %v539_v47  ;;  %v1722_v51 = vpop.eup %1413 }
 0x17f   : > { %1417 = vpow2.f32 %v561_v48 }
 0x180   : > { %v526_v49 = vpop.xlane.xlu2 %525 }
 0x181   : > { %v545_v50 = vsub.f32 %v1687_v12, %v526_v49  ;;  %v1285_v12 = vld [vmem:[%s1728_s13 + $0x28] sm:$0xff] }
 0x182   : > { %943 = vmatpush.bf16.msra.mxu1 %v1285_v12  ;;  %1338 = vmatpush.bf16.msra.mxu3 %v1285_v12 }
 0x183   : > { %v1730_v52 = vpop.eup %1415  ;;  %v573_v53 = vmul.f32 1.442695, %v545_v50 }
 0x184   : > { %603 = vadd.xlane.f32.xlu0 %v1730_v52  ;;  %591 = vadd.xlane.f32.xlu2 %v1722_v51 }
 0x185   : > { %1419 = vpow2.f32 %v573_v53  ;;  %v1737_v59 = vpop.eup %1417 }
 0x188   : > { %v516_v55 = vpop.xlane.xlu2 %515  ;;  %v528_v56 = vpop.xlane.xlu0 %527 }
 0x189   : > { %v540_v57 = vsub.f32 %v1680_v3, %v516_v55  ;;  %v546_v58 = vsub.f32 %v1690_v13, %v528_v56  ;;  %v1283_v13 = vld [vmem:[%s1728_s13 + $0x18] sm:$0xff] }
 0x18b   : > { %v1739_v60 = vpop.eup %1419  ;;  %v563_v61 = vmul.f32 1.442695, %v540_v57  ;;  %v575_v62 = vmul.f32 1.442695, %v546_v58 }
 0x18c   : > { %605 = vadd.xlane.f32.xlu0 %v1739_v60  ;;  %593 = vadd.xlane.f32.xlu2 %v1737_v59 }
 0x18d   : > { %1421 = vpow2.f32 %v563_v61 }
 0x18e   : > { %1423 = vpow2.f32 %v575_v62 }
 0x190   : > { %v530_v63 = vpop.xlane.xlu2 %529 }
 0x191   : > { %v547_v0 = vsub.f32 %v1694_v14, %v530_v63  ;;  %v1282_v14 = vld [vmem:[%s1728_s13 + $0x10] sm:$0xff] }
 0x193   : > { %v1744_v1 = vpop.eup %1421  ;;  %v577_v2 = vmul.f32 1.442695, %v547_v0 }
 0x194   : > { %v1746_v3 = vpop.eup %1423  ;;  %595 = vadd.xlane.f32.xlu0 %v1744_v1 }
 0x195   : > { %1425 = vpow2.f32 %v577_v2  ;;  %607 = vadd.xlane.f32.xlu1 %v1746_v3 }
 0x198   : > { %v520_v4 = vpop.xlane.xlu2 %519 }
 0x199   : > { %v542_v6 = vsub.f32 %v1684_v7, %v520_v4  ;;  %v1284_v7 = vld [vmem:[%s1728_s13 + $0x20] sm:$0xff]  ;;  %s1481_s13 = scalar_lea.hbm %s1480_s12, 128 }
 0x19a   : > { %944 = vmatpush.bf16.msra.mxu1 %v1284_v7  ;;  %1339 = vmatpush.bf16.msra.mxu3 %v1284_v7  ;;  %p1482_p12 = scmp.ne.s32.totalorder %s1480_s12, %s1481_s13 }
 0x19b   : > { %v1751_v8 = vpop.eup %1425  ;;  %v567_v9 = vmul.f32 1.442695, %v542_v6 }
 0x19c   : > { %p1483_p13 = pnand %p1482_p12, %p1612_p4 }
 0x19d   : > { %1427 = vpow2.f32 %v567_v9  ;;  %609 = vadd.xlane.f32.xlu1 %v1751_v8 }
 0x19e   : > { %945 = vmatpush.bf16.msra.mxu1 %v1283_v13  ;;  %1340 = vmatpush.bf16.msra.mxu3 %v1283_v13  ;;  %p1484_p0 = pneg %p1483_p13 }
 0x1a2   : > { %946 = vmatpush.bf16.msra.mxu1 %v1282_v14  ;;  %1341 = vmatpush.bf16.msra.mxu3 %v1282_v14 }
 0x1a3   : > { %v1754_v10 = vpop.eup %1427 }
 0x1a5   : > { %599 = vadd.xlane.f32.xlu1 %v1754_v10 }
 0x1a6   : > { %947 = vmatpush.bf16.msra.mxu1 %v1281_v15  ;;  %1342 = vmatpush.bf16.msra.mxu3 %v1281_v15 }
 0x1aa   : > { %948 = vmatpush.bf16.msra.mxu1 %v1280_v16  ;;  %1343 = vmatpush.bf16.msra.mxu3 %v1280_v16 }
 0x1c9   : > { %v582_v17 = vpop.xlane.xlu0 %581 }
 0x1ca   : > { %1429 = vrcp.f32 %v582_v17  ;;  %v624_v30 = vand.u32 2147483648, %v582_v17  ;;  %v622_v31 = vand.u32 2147483647, %v582_v17  ;;  %vm618_vm2 = vweird.f32 %v582_v17 }
 0x1cc   : > { %vm623_vm4 = vcmp.eq.f32.partialorder %v622_v31, 8.507059e+37 }
 0x1d0   : > { %v1430_v18 = vpop.eup %1429 }
 0x1d1   : > { %v614_v19 = vmul.f32 %v1430_v18, %v582_v17  ;;  %v532_v21 = vpop.xlane.xlu0 %531  ;;  %v584_v22 = vpop.xlane.xlu1 %583  ;;  %vm619_vm1 = vweird.f32 %v1430_v18 }
 0x1d2   : > { %v548_v23 = vsub.f32 %v1703_v25, %v532_v21  ;;  %1431 = vrcp.f32 %v584_v22  ;;  %vm620_vm3 = vmor %vm618_vm2, %vm619_vm1  ;;  %v625_v25 = vor.u32 1.1754944e-38, %v624_v30  ;;  %v638_v44 = vand.u32 2147483648, %v584_v22 }
 0x1d3   : > { %v615_v26 = vsub.f32 1.0, %v614_v19  ;;  %v636_v49 = vand.u32 2147483647, %v584_v22  ;;  %vm632_vm6 = vweird.f32 %v584_v22 }
 0x1d4   : > { %v579_v27 = vmul.f32 1.442695, %v548_v23  ;;  %v639_v53 = vor.u32 1.1754944e-38, %v638_v44 }
 0x1d5   : > { %v616_v28 = vmul.f32 %v1430_v18, %v615_v26  ;;  %vm637_vm8 = vcmp.eq.f32.partialorder %v636_v49, 8.507059e+37 }
 0x1d6   : > { %1433 = vpow2.f32 %v579_v27 }
 0x1d7   : > { %v617_v32 = vadd.f32 %v1430_v18, %v616_v28 }
 0x1d8   : > { %v1432_v34 = vpop.eup %1431 }
 0x1d9   : > { %v628_v35 = vmul.f32 %v1432_v34, %v584_v22  ;;  %v586_v36 = vpop.xlane.xlu0 %585  ;;  %v518_v37 = vpop.xlane.xlu1 %517  ;;  %v621_v38 = vsel %vm620_vm3, %v1430_v18, %v617_v32  ;;  %vm633_vm5 = vweird.f32 %v1432_v34 }
 0x1da   : > { %1435 = vrcp.f32 %v586_v36  ;;  %v541_v39 = vsub.f32 %v1682_v5, %v518_v37  ;;  %v626_v42 = vsel %vm623_vm4, %v625_v25, %v621_v38  ;;  %vm634_vm7 = vmor %vm632_vm6, %vm633_vm5  ;;  %v652_v62 = vand.u32 2147483648, %v586_v36 }
 0x1db   : > { %v629_v41 = vsub.f32 1.0, %v628_v35  ;;  %v837_v47 = vmul.f32 %v1698_v20, %v626_v42  ;;  %v650_v2 = vand.u32 2147483647, %v586_v36  ;;  %vm646_vm10 = vweird.f32 %v586_v36 }
 0x1dc   : > { %v1769_v43 = vpop.eup %1433  ;;  %v565_v46 = vmul.f32 1.442695, %v541_v39  ;;  %v653_v9 = vor.u32 1.1754944e-38, %v652_v62 }
 0x1dd   : > { %v630_v48 = vmul.f32 %v1432_v34, %v629_v41  ;;  %611 = vadd.xlane.f32.xlu2 %v1769_v43  ;;  %861 = vst [vmem:[%s1773_s22] sm:$0xff] %v837_v47  ;;  %vm651_vm12 = vcmp.eq.f32.partialorder %v650_v2, 8.507059e+37 }
 0x1de   : > { %1437 = vpow2.f32 %v565_v46 }
 0x1df   : > { %v631_v5 = vadd.f32 %v1432_v34, %v630_v48 }
 0x1e0   : > { %v1436_v50 = vpop.eup %1435 }
 0x1e1   : > { %v642_v54 = vmul.f32 %v1436_v50, %v586_v36  ;;  %v588_v55 = vpop.xlane.xlu1 %587  ;;  %v635_v56 = vsel %vm634_vm7, %v1432_v34, %v631_v5  ;;  %vm647_vm9 = vweird.f32 %v1436_v50 }
 0x1e2   : > { %1439 = vrcp.f32 %v588_v55  ;;  %v640_v20 = vsel %vm637_vm8, %v639_v53, %v635_v56  ;;  %vm648_vm11 = vmor %vm646_vm10, %vm647_vm9  ;;  %v666_v15 = vand.u32 2147483648, %v588_v55  ;;  %v664_v17 = vand.u32 2147483647, %v588_v55 }
 0x1e3   : > { %v643_v57 = vsub.f32 1.0, %v642_v54  ;;  %v838_v58 = vmul.f32 %v1701_v24, %v640_v20  ;;  %vm660_vm14 = vweird.f32 %v588_v55 }
 0x1e4   : > { %v1777_v61 = vpop.eup %1437  ;;  %v667_v22 = vor.u32 1.1754944e-38, %v666_v15  ;;  %vm665_vm1 = vcmp.eq.f32.partialorder %v664_v17, 8.507059e+37 }
 0x1e5   : > { %v644_v63 = vmul.f32 %v1436_v50, %v643_v57  ;;  %597 = vadd.xlane.f32.xlu0 %v1777_v61  ;;  %v853_v0 = vpack.c.bf16 %v838_v58, %v837_v47  ;;  %862 = vst [vmem:[%s1773_s22 + $0x8] sm:$0xff] %v838_v58 }
 0x1e7   : > { %949 = vmatmul.bf16.vlgmr.msra.gmra.mxu1 %v853_v0  ;;  %v645_v4 = vadd.f32 %v1436_v50, %v644_v63 }
 0x1e8   : > { %v1440_v6 = vpop.eup %1439 }
 0x1e9   : > { %v656_v11 = vmul.f32 %v1440_v6, %v588_v55  ;;  %v590_v12 = vpop.xlane.xlu1 %589  ;;  %v649_v24 = vsel %vm648_vm11, %v1436_v50, %v645_v4  ;;  %vm661_vm13 = vweird.f32 %v1440_v6 }
 0x1ea   : > { %1441 = vrcp.f32 %v590_v12  ;;  %v654_v7 = vsel %vm651_vm12, %v653_v9, %v649_v24  ;;  %vm662_vm15 = vmor %vm660_vm14, %vm661_vm13  ;;  %v680_v30 = vand.u32 2147483648, %v590_v12  ;;  %v678_v34 = vand.u32 2147483647, %v590_v12 }
 0x1eb   : > { %v657_v13 = vsub.f32 1.0, %v656_v11  ;;  %v839_v14 = vmul.f32 %v1707_v29, %v654_v7  ;;  %vm674_vm3 = vweird.f32 %v590_v12 }
 0x1ec   : > { %vm679_vm5 = vcmp.eq.f32.partialorder %v678_v34, 8.507059e+37 }
 0x1ed   : > { %v658_v16 = vmul.f32 %v1440_v6, %v657_v13  ;;  %863 = vst [vmem:[%s1773_s22 + $0x10] sm:$0xff] %v839_v14 }
 0x1ef   : > { %v602_v18 = vpop.xlane.xlu2 %601  ;;  %v659_v19 = vadd.f32 %v1440_v6, %v658_v16 }
 0x1f0   : > { %v1442_v21 = vpop.eup %1441  ;;  %1443 = vrcp.f32 %v602_v18  ;;  %v764_v47 = vand.u32 2147483648, %v602_v18  ;;  %vm758_vm7 = vweird.f32 %v602_v18  ;;  %v762_v49 = vand.u32 2147483647, %v602_v18 }
 0x1f1   : > { %v670_v23 = vmul.f32 %v1442_v21, %v590_v12  ;;  %v663_v26 = vsel %vm662_vm15, %v1440_v6, %v659_v19  ;;  %vm675_vm2 = vweird.f32 %v1442_v21 }
 0x1f2   : > { %v668_v27 = vsel %vm665_vm1, %v667_v22, %v663_v26  ;;  %vm676_vm4 = vmor %vm674_vm3, %vm675_vm2  ;;  %v765_v20 = vor.u32 1.1754944e-38, %v764_v47  ;;  %vm763_vm9 = vcmp.eq.f32.partialorder %v762_v49, 8.507059e+37 }
 0x1f3   : > { %v671_v28 = vsub.f32 1.0, %v670_v23  ;;  %v840_v29 = vmul.f32 %v1711_v33, %v668_v27  ;;  %v681_v33 = vor.u32 1.1754944e-38, %v680_v30 }
 0x1f5   : > { %v672_v31 = vmul.f32 %v1442_v21, %v671_v28  ;;  %v854_v32 = vpack.c.bf16 %v840_v29, %v839_v14  ;;  %864 = vst [vmem:[%s1773_s22 + $0x18] sm:$0xff] %v840_v29 }
 0x1f6   : > { %v1444_v35 = vpop.eup %1443 }
 0x1f7   : > { %v754_v36 = vmul.f32 %v1444_v35, %v602_v18  ;;  %v1785_v37 = vpop.xlane.xlu0 %603  ;;  %v1787_v38 = vpop.xlane.xlu2 %591  ;;  %954 = vmatmul.bf16.gmra.mxu1 %v854_v32  ;;  %v673_v25 = vadd.f32 %v1442_v21, %v672_v31  ;;  %vm759_vm6 = vweird.f32 %v1444_v35 }
 0x1f8   : > { %1445 = vrcp.f32 %v1785_v37  ;;  %vm760_vm8 = vmor %vm758_vm7, %vm759_vm6  ;;  %v778_v0 = vand.u32 2147483648, %v1785_v37  ;;  %v694_v6 = vand.u32 2147483648, %v1787_v38  ;;  %v692_v9 = vand.u32 2147483647, %v1787_v38 }
 0x1f9   : > { %v755_v39 = vsub.f32 1.0, %v754_v36  ;;  %1447 = vrcp.f32 %v1787_v38  ;;  %v677_v41 = vsel %vm676_vm4, %v1442_v21, %v673_v25  ;;  %vm772_vm11 = vweird.f32 %v1785_v37 }
 0x1fa   : > { %v682_v42 = vsel %vm679_vm5, %v681_v33, %v677_v41  ;;  %v776_v12 = vand.u32 2147483647, %v1785_v37  ;;  %vm688_vm14 = vweird.f32 %v1787_v38  ;;  %v779_v17 = vor.u32 1.1754944e-38, %v778_v0 }
 0x1fb   : > { %v756_v44 = vmul.f32 %v1444_v35, %v755_v39  ;;  %v1792_v46 = vmul.f32 %v1714_v40, %v682_v42  ;;  %vm693_vm15 = vcmp.eq.f32.partialorder %v692_v9, 8.507059e+37  ;;  %v695_v21 = vor.u32 1.1754944e-38, %v694_v6 }
 0x1fc   : > { %vm777_vm2 = vcmp.eq.f32.partialorder %v776_v12, 8.507059e+37 }
 0x1fd   : > { %865 = vst [vmem:[%s1773_s22 + $0x20] sm:$0xff] %v1792_v46  ;;  %v757_v48 = vadd.f32 %v1444_v35, %v756_v44 }
 0x1fe   : > { %v1446_v5 = vpop.eup %1445 }
 0x1ff   : > { %v1448_v50 = vpop.eup %1447  ;;  %v768_v53 = vmul.f32 %v1446_v5, %v1785_v37  ;;  %v1797_v54 = vpop.xlane.xlu0 %605  ;;  %v761_v56 = vsel %vm760_vm8, %v1444_v35, %v757_v48  ;;  %vm773_vm10 = vweird.f32 %v1446_v5 }
 0x200   : > { %v1799_v55 = vpop.xlane.xlu2 %593  ;;  %v684_v40 = vmul.f32 %v1448_v50, %v1787_v38  ;;  %1449 = vrcp.f32 %v1797_v54  ;;  %v766_v62 = vsel %vm763_vm9, %v765_v20, %v761_v56  ;;  %vm689_vm12 = vweird.f32 %v1448_v50  ;;  %vm1811_vm13 = vmor %vm772_vm11, %vm773_vm10 }
 0x201   : > { %v769_v57 = vsub.f32 1.0, %v768_v53  ;;  %1451 = vrcp.f32 %v1799_v55  ;;  %v847_v2 = vmul.f32 %v1717_v45, %v766_v62  ;;  %v792_v23 = vand.u32 2147483648, %v1797_v54  ;;  %vm690_vm1 = vmor %vm688_vm14, %vm689_vm12 }
 0x202   : > { %v685_v58 = vsub.f32 1.0, %v684_v40  ;;  %v790_v29 = vand.u32 2147483647, %v1797_v54  ;;  %v708_v35 = vand.u32 2147483648, %v1799_v55  ;;  %vm786_vm5 = vweird.f32 %v1797_v54 }
 0x203   : > { %v770_v63 = vmul.f32 %v1446_v5, %v769_v57  ;;  %871 = vst [vmem:[%s1773_s22 + $0x50] sm:$0xff] %v847_v2  ;;  %v706_v38 = vand.u32 2147483647, %v1799_v55  ;;  %vm702_vm6 = vweird.f32 %v1799_v55  ;;  %v793_v41 = vor.u32 1.1754944e-38, %v792_v23 }
 0x204   : > { %v686_v4 = vmul.f32 %v1448_v50, %v685_v58  ;;  %vm791_vm9 = vcmp.eq.f32.partialorder %v790_v29, 8.507059e+37 }
 0x205   : > { %v771_v11 = vadd.f32 %v1446_v5, %v770_v63  ;;  %vm707_vm10 = vcmp.eq.f32.partialorder %v706_v38, 8.507059e+37 }
 0x206   : > { %v1450_v24 = vpop.eup %1449  ;;  %v687_v7 = vadd.f32 %v1448_v50, %v686_v4 }
 0x207   : > { %v1452_v14 = vpop.eup %1451  ;;  %v782_v45 = vmul.f32 %v1450_v24, %v1797_v54  ;;  %v1817_v15 = vpop.xlane.xlu0 %595  ;;  %v775_v16 = vsel %vm1811_vm13, %v1446_v5, %v771_v11  ;;  %vm787_vm3 = vweird.f32 %v1450_v24  ;;  %v709_v5 = vor.u32 1.1754944e-38, %v708_v35 }
 0x208   : > { %v698_v18 = vmul.f32 %v1452_v14, %v1799_v55  ;;  %1453 = vrcp.f32 %v1817_v15  ;;  %v1823_v19 = vpop.xlane.xlu1 %607  ;;  %v691_v27 = vsel %vm690_vm1, %v1448_v50, %v687_v7  ;;  %v780_v28 = vsel %vm777_vm2, %v779_v17, %v775_v16  ;;  %vm788_vm7 = vmor %vm786_vm5, %vm787_vm3 }
 0x209   : > { %v783_v22 = vsub.f32 1.0, %v782_v45  ;;  %1455 = vrcp.f32 %v1823_v19  ;;  %v696_v31 = vsel %vm693_vm15, %v695_v21, %v691_v27  ;;  %v848_v32 = vmul.f32 %v1730_v52, %v780_v28 }
 0x20a   : > { %v699_v26 = vsub.f32 1.0, %v698_v18  ;;  %v842_v36 = vmul.f32 %v1722_v51, %v696_v31  ;;  %vm703_vm4 = vweird.f32 %v1452_v14  ;;  %v722_v53 = vand.u32 2147483648, %v1817_v15 }
 0x20b   : > { %v784_v30 = vmul.f32 %v1450_v24, %v783_v22  ;;  %v858_v37 = vpack.c.bf16 %v848_v32, %v847_v2  ;;  %872 = vst [vmem:[%s1773_s22 + $0x58] sm:$0xff] %v848_v32  ;;  %vm704_vm8 = vmor %vm702_vm6, %vm703_vm4  ;;  %v720_v20 = vand.u32 2147483647, %v1817_v15  ;;  %v806_v62 = vand.u32 2147483648, %v1823_v19 }
 0x20c   : > { %v700_v34 = vmul.f32 %v1452_v14, %v699_v26  ;;  %v855_v39 = vpack.c.bf16 %v842_v36, %v1792_v46  ;;  %866 = vst [vmem:[%s1773_s22 + $0x28] sm:$0xff] %v842_v36  ;;  %vm716_vm13 = vweird.f32 %v1817_v15  ;;  %v804_v0 = vand.u32 2147483647, %v1823_v19 }
 0x20d   : > { %v785_v25 = vadd.f32 %v1450_v24, %v784_v30  ;;  %974 = vmatmul.bf16.vlgmr.msra.gmra.mxu3 %v858_v37  ;;  %vm800_vm14 = vweird.f32 %v1823_v19  ;;  %vm721_vm1 = vcmp.eq.f32.partialorder %v720_v20, 8.507059e+37 }
 0x20e   : > { %v1454_v33 = vpop.eup %1453  ;;  %v701_v52 = vadd.f32 %v1452_v14, %v700_v34  ;;  %959 = vmatmul.bf16.gmra.mxu1 %v855_v39  ;;  %vm805_vm3 = vcmp.eq.f32.partialorder %v804_v0, 8.507059e+37 }
 0x20f   : > { %v1456_v42 = vpop.eup %1455  ;;  %v712_v51 = vmul.f32 %v1454_v33, %v1817_v15  ;;  %v789_v44 = vsel %vm788_vm7, %v1450_v24, %v785_v25  ;;  %vm717_vm11 = vweird.f32 %v1454_v33  ;;  %v807_v24 = vor.u32 1.1754944e-38, %v806_v62 }
 0x210   : > { %v796_v47 = vmul.f32 %v1456_v42, %v1823_v19  ;;  %v610_v48 = vpop.xlane.xlu1 %609  ;;  %v705_v49 = vsel %vm704_vm8, %v1452_v14, %v701_v52  ;;  %v794_v46 = vsel %vm791_vm9, %v793_v41, %v789_v44  ;;  %vm801_vm12 = vweird.f32 %v1456_v42  ;;  %vm718_vm15 = vmor %vm716_vm13, %vm717_vm11 }
 0x211   : > { %v713_v50 = vsub.f32 1.0, %v712_v51  ;;  %1457 = vrcp.f32 %v610_v48  ;;  %v710_v55 = vsel %vm707_vm10, %v709_v5, %v705_v49  ;;  %v849_v56 = vmul.f32 %v1739_v60, %v794_v46  ;;  %vm802_vm2 = vmor %vm800_vm14, %vm801_vm12 }
 0x212   : > { %v797_v54 = vsub.f32 1.0, %v796_v47  ;;  %v843_v57 = vmul.f32 %v1737_v59, %v710_v55  ;;  %v723_v60 = vor.u32 1.1754944e-38, %v722_v53  ;;  %v820_v45 = vand.u32 2147483648, %v610_v48 }
 0x213   : > { %v714_v40 = vmul.f32 %v1454_v33, %v713_v50  ;;  %873 = vst [vmem:[%s1773_s22 + $0x60] sm:$0xff] %v849_v56  ;;  %v818_v18 = vand.u32 2147483647, %v610_v48  ;;  %vm814_vm5 = vweird.f32 %v610_v48 }
 0x214   : > { %v798_v58 = vmul.f32 %v1456_v42, %v797_v54  ;;  %867 = vst [vmem:[%s1773_s22 + $0x30] sm:$0xff] %v843_v57  ;;  %v821_v23 = vor.u32 1.1754944e-38, %v820_v45 }
 0x215   : > { %v715_v63 = vadd.f32 %v1454_v33, %v714_v40  ;;  %vm819_vm7 = vcmp.eq.f32.partialorder %v818_v18, 8.507059e+37 }
 0x216   : > { %v799_v2 = vadd.f32 %v1456_v42, %v798_v58 }
 0x217   : > { %v1458_v4 = vpop.eup %1457  ;;  %v719_v6 = vsel %vm718_vm15, %v1454_v33, %v715_v63 }
 0x218   : > { %v810_v59 = vmul.f32 %v1458_v4, %v610_v48  ;;  %v600_v9 = vpop.xlane.xlu1 %599  ;;  %v724_v11 = vsel %vm721_vm1, %v723_v60, %v719_v6  ;;  %v803_v12 = vsel %vm802_vm2, %v1456_v42, %v799_v2  ;;  %vm815_vm4 = vweird.f32 %v1458_v4 }
 0x219   : > { %1459 = vrcp.f32 %v600_v9  ;;  %v844_v13 = vmul.f32 %v1744_v1, %v724_v11  ;;  %v808_v14 = vsel %vm805_vm3, %v807_v24, %v803_v12  ;;  %vm816_vm6 = vmor %vm814_vm5, %vm815_vm4  ;;  %v750_v29 = vand.u32 2147483648, %v600_v9 }
 0x21a   : > { %v811_v7 = vsub.f32 1.0, %v810_v59  ;;  %v850_v15 = vmul.f32 %v1746_v3, %v808_v14  ;;  %v748_v31 = vand.u32 2147483647, %v600_v9  ;;  %vm744_vm9 = vweird.f32 %v600_v9 }
 0x21b   : > { %v856_v17 = vpack.c.bf16 %v844_v13, %v843_v57  ;;  %868 = vst [vmem:[%s1773_s22 + $0x38] sm:$0xff] %v844_v13  ;;  %v751_v34 = vor.u32 1.1754944e-38, %v750_v29 }
 0x21c   : > { %v812_v16 = vmul.f32 %v1458_v4, %v811_v7  ;;  %v859_v19 = vpack.c.bf16 %v850_v15, %v849_v56  ;;  %874 = vst [vmem:[%s1773_s22 + $0x68] sm:$0xff] %v850_v15  ;;  %vm749_vm11 = vcmp.eq.f32.partialorder %v748_v31, 8.507059e+37 }
 0x21e   : > { %v813_v21 = vadd.f32 %v1458_v4, %v812_v16  ;;  %979 = vmatmul.bf16.gmra.mxu3 %v859_v19  ;;  %964 = vmatmul.bf16.gmra.mxu1 %v856_v17 }
 0x21f   : > { %v1460_v22 = vpop.eup %1459 }
 0x220   : > { %v740_v26 = vmul.f32 %v1460_v22, %v600_v9  ;;  %v817_v1 = vsel %vm816_vm6, %v1458_v4, %v813_v21  ;;  %vm745_vm8 = vweird.f32 %v1460_v22 }
 0x221   : > { %v822_v27 = vsel %vm819_vm7, %v821_v23, %v817_v1  ;;  %vm746_vm10 = vmor %vm744_vm9, %vm745_vm8 }
 0x222   : > { %v741_v3 = vsub.f32 1.0, %v740_v26  ;;  %v851_v28 = vmul.f32 %v1751_v8, %v822_v27 }
 0x224   : > { %v742_v30 = vmul.f32 %v1460_v22, %v741_v3  ;;  %875 = vst [vmem:[%s1773_s22 + $0x70] sm:$0xff] %v851_v28 }
 0x226   : > { %v743_v32 = vadd.f32 %v1460_v22, %v742_v30 }
 0x228   : > { %v747_v35 = vsel %vm746_vm10, %v1460_v22, %v743_v32 }
 0x229   : > { %v752_v36 = vsel %vm749_vm11, %v751_v34, %v747_v35 }
 0x22a   : > { %v846_v37 = vmul.f32 %v1754_v10, %v752_v36 }
 0x22c   : > { %870 = vst [vmem:[%s1773_s22 + $0x48] sm:$0xff] %v846_v37 }
 0x250   : > { %v612_v38 = vpop.xlane.xlu2 %611 }
 0x251   : > { %1461 = vrcp.f32 %v612_v38  ;;  %v834_v52 = vand.u32 2147483648, %v612_v38  ;;  %v832_v42 = vand.u32 2147483647, %v612_v38  ;;  %vm828_vm13 = vweird.f32 %v612_v38 }
 0x253   : > { %v835_v47 = vor.u32 1.1754944e-38, %v834_v52  ;;  %vm833_vm15 = vcmp.eq.f32.partialorder %v832_v42, 8.507059e+37 }
 0x257   : > { %v1462_v25 = vpop.eup %1461 }
 0x258   : > { %v824_v8 = vmul.f32 %v1462_v25, %v612_v38  ;;  %v598_v33 = vpop.xlane.xlu0 %597  ;;  %vm829_vm12 = vweird.f32 %v1462_v25 }
 0x259   : > { %1463 = vrcp.f32 %v598_v33  ;;  %vm830_vm14 = vmor %vm828_vm13, %vm829_vm12  ;;  %v736_v50 = vand.u32 2147483648, %v598_v33  ;;  %v734_v54 = vand.u32 2147483647, %v598_v33  ;;  %vm730_vm2 = vweird.f32 %v598_v33 }
 0x25a   : > { %v825_v39 = vsub.f32 1.0, %v824_v8 }
 0x25b   : > { %v737_v20 = vor.u32 1.1754944e-38, %v736_v50  ;;  %vm735_vm4 = vcmp.eq.f32.partialorder %v734_v54, 8.507059e+37 }
 0x25c   : > { %v826_v41 = vmul.f32 %v1462_v25, %v825_v39 }
 0x25e   : > { %v827_v51 = vadd.f32 %v1462_v25, %v826_v41 }
 0x25f   : > { %v1464_v44 = vpop.eup %1463 }
 0x260   : > { %v726_v10 = vmul.f32 %v1464_v44, %v598_v33  ;;  %v831_v48 = vsel %vm830_vm14, %v1462_v25, %v827_v51  ;;  %vm731_vm1 = vweird.f32 %v1464_v44 }
 0x261   : > { %v836_v49 = vsel %vm833_vm15, %v835_v47, %v831_v48  ;;  %vm732_vm3 = vmor %vm730_vm2, %vm731_vm1 }
 0x262   : > { %v727_v5 = vsub.f32 1.0, %v726_v10  ;;  %v852_v46 = vmul.f32 %v1769_v43, %v836_v49 }
 0x264   : > { %v728_v53 = vmul.f32 %v1464_v44, %v727_v5  ;;  %v950_v55 = vpop.f32.mrf.mxu1  ;;  %v860_v56 = vpack.c.bf16 %v852_v46, %v851_v28  ;;  %876 = vst [vmem:[%s1773_s22 + $0x78] sm:$0xff] %v852_v46 }
 0x265   : > { %990 = vst.msk [vmem:[%s1864_s5] sm:$0xff] %vm403_vm0, %v950_v55 }
 0x266   : > { %v729_v40 = vadd.f32 %v1464_v44, %v728_v53  ;;  %984 = vmatmul.bf16.gmra.mxu3 %v860_v56 }
 0x268   : > { %v733_v43 = vsel %vm732_vm3, %v1464_v44, %v729_v40 }
 0x269   : > { %v738_v57 = vsel %vm735_vm4, %v737_v20, %v733_v43 }
 0x26a   : > { %v845_v58 = vmul.f32 %v1777_v61, %v738_v57 }
 0x26c   : > { %v952_v62 = vpop.f32.mrf.mxu1  ;;  %v857_v63 = vpack.c.bf16 %v846_v37, %v845_v58  ;;  %869 = vst [vmem:[%s1773_s22 + $0x40] sm:$0xff] %v845_v58  ;;  %s1485_s22 = scalar_lea.hbm %s1945_s4, 512 }
 0x26d   : > { %991 = vst.msk [vmem:[%s1864_s5 + $0x8] sm:$0xff] %vm403_vm0, %v952_v62  ;;  %p1487_p2 = scmp.lt.s32.totalorder %s1485_s22, %s1481_s13 }
 0x26e   : > { %969 = vmatmul.bf16.gmra.mxu1 %v857_v63 }
 0x26f   : > { %p1488_p3 = por %p1487_p2, %p1486_p1 }
 0x271   : > { %p1489_p5 = pnand %p1488_p3, %p1484_p0 }
 0x274   : > { %v955_v0 = vpop.f32.mrf.mxu1 }
 0x275   : > { %992 = vst.msk [vmem:[%s1864_s5 + $0x10] sm:$0xff] %vm403_vm0, %v955_v0 }
 0x276   : > { %1492 = shalt.err (!%p1489_p5)
}
 0x277   : > { %s1545_s14 = smov 128   ;;  %s1546_s30 = smov 8  }
 0x278   : > { %1344 = dma.vmem_to_hbm [thread:$0]  (%p1612_p4), %s1035_s6, 2048, %s1037_s10, %s1016_s11, %s1545_s14, %s1545_s14, %s1546_s30  }
 0x27c   : > { %v957_v61 = vpop.f32.mrf.mxu1 }
 0x27d   : > { %993 = vst.msk [vmem:[%s1864_s5 + $0x18] sm:$0xff] %vm403_vm0, %v957_v61 }
 0x28b   : > { %v960_v60 = vpop.f32.mrf.mxu1 }
 0x28c   : > { %994 = vst.msk [vmem:[%s1864_s5 + $0x20] sm:$0xff] %vm403_vm0, %v960_v60 }
 0x290   : > { %v975_v2 = vpop.f32.mrf.mxu3 }
 0x291   : > { %1000 = vst.msk [vmem:[%s1864_s5 + $0x50] sm:$0xff] %vm403_vm0, %v975_v2 }
 0x293   : > { %v962_v4 = vpop.f32.mrf.mxu1 }
 0x294   : > { %995 = vst.msk [vmem:[%s1864_s5 + $0x28] sm:$0xff] %vm403_vm0, %v962_v4 }
 0x298   : > { %v977_v6 = vpop.f32.mrf.mxu3 }
 0x299   : > { %1001 = vst.msk [vmem:[%s1864_s5 + $0x58] sm:$0xff] %vm403_vm0, %v977_v6 }
 0x29b   : > { %v965_v59 = vpop.f32.mrf.mxu1 }
 0x29c   : > { %996 = vst.msk [vmem:[%s1864_s5 + $0x30] sm:$0xff] %vm403_vm0, %v965_v59 }
 0x2a1   : > { %v980_v9 = vpop.f32.mrf.mxu3 }
 0x2a2   : > { %1002 = vst.msk [vmem:[%s1864_s5 + $0x60] sm:$0xff] %vm403_vm0, %v980_v9 }
 0x2a3   : > { %v967_v11 = vpop.f32.mrf.mxu1 }
 0x2a4   : > { %997 = vst.msk [vmem:[%s1864_s5 + $0x38] sm:$0xff] %vm403_vm0, %v967_v11 }
 0x2a9   : > { %v982_v12 = vpop.f32.mrf.mxu3 }
 0x2aa   : > { %1003 = vst.msk [vmem:[%s1864_s5 + $0x68] sm:$0xff] %vm403_vm0, %v982_v12 }
 0x2e9   : > { %v985_v24 = vpop.f32.mrf.mxu3 }
 0x2ea   : > { %1004 = vst.msk [vmem:[%s1864_s5 + $0x70] sm:$0xff] %vm403_vm0, %v985_v24 }
 0x2eb   : > { %v970_v7 = vpop.f32.mrf.mxu1 }
 0x2ec   : > { %998 = vst.msk [vmem:[%s1864_s5 + $0x40] sm:$0xff] %vm403_vm0, %v970_v7 }
 0x2f1   : > { %v987_v13 = vpop.f32.mrf.mxu3 }
 0x2f2   : > { %1005 = vst.msk [vmem:[%s1864_s5 + $0x78] sm:$0xff] %vm403_vm0, %v987_v13 }
 0x2f3   : > { %v972_v14 = vpop.f32.mrf.mxu1 }
 0x2f4   : > { %999 = vst.msk [vmem:[%s1864_s5 + $0x48] sm:$0xff] %vm403_vm0, %v972_v14 }
 0x2f5 PF: > { %p1350_p4 = scmp.ge.s32.totalorder %s1543_s20, 2  ;;  %s1063_s25 = sand.u32 1, %s1523_s15  }
 0x2f6   : > { %s1064_s29 = scalar_lea.sflag [#allocation3], %s1063_s25 }
 0x2f7   : > { %p1347_p6 = pnand %p1350_p4, %p1619_p8 }
 0x2f9   : > { %p1348_p7 = pneg %p1347_p6 }
 0x2fb   : > { %1518 = dma.done.wait (%p1348_p7), %s1064_s29, 2048  }
 0x2fc   : > { %1520 = vsyncadd (%p1348_p7), %s1064_s29, 4294965248  ;;  %s18_s20 = sadd.s32 1, %s1543_s20   ;;  %s1950_s15 = smov %s1527_s16 }
 0x2fd   : > { %p15_p9 = scmp.ge.s32.totalorder %s18_s20, 6   ;;  %s1951_s16 = smov %s1531_s17 }
 0x2fe   : > { %s1952_s17 = smov %s1625_s28  ;;  %s1953_s18 = smov %s1539_s19 }
 0x2ff   : > { %s1954_s19 = smov %s1956_s23  ;;  %17 = sbr.rel (!%p15_p9) target bundleno = 4 (0x4), region = 85 }
 0x304   :  { %1070 = vsyncpa [#allocation3], 1 }
 0x305   :  { %1072 = vsyncpa [#allocation3 + $0x1], 1 }

</bundles_post_ra>
